<compile_context>
chip_gen: v7x
topology: tpu7x:2x2x1
jax: 0.10.0
libtpu: 0.0.40
codegen_flags: <defaults>
</compile_context>

<pallas_src>
import functools
import math

import jax
import jax.numpy as jnp
from jax.experimental import pallas as pl
from jax.experimental.pallas import tpu as pltpu

_LN2 = math.log(2.0)

# Double-buffered (in + out) block bytes are kept under this (v7x-safe, leaves headroom).
_VMEM_DATA_BUDGET = 26 << 20


# --------------------------------------------------------------------------------------
# Kernels
# --------------------------------------------------------------------------------------
def _gem_pair(a, b, p, out_dtype):
    """((a**p + b**p)/2) ** (1/p) for clamped f32 inputs a, b >= eps, runtime scalar p.

    Log-sum-exp form: 5 EUP ops/output (log a, log b, exp, log, exp); max/min/mul/add ride the
    otherwise-idle VPU.  1/p uses an exact scalar divide (approx reciprocal error ~2^-12 would be
    amplified by |log(pool)| in the exponent and break f32-level accuracy).
    """
    inv_p = 1.0 / p
    sa = p * jnp.log(a)
    sb = p * jnp.log(b)
    hi = jnp.maximum(sa, sb)
    lo = jnp.minimum(sa, sb)
    pooled_log = hi + jnp.log(jnp.float32(1.0) + jnp.exp(lo - hi))   # = log(a**p + b**p)
    return jnp.exp((pooled_log - jnp.float32(_LN2)) * inv_p).astype(out_dtype)


def _gem_kernel_paired(p_ref, x_ref, o_ref, *, eps):
    """p_ref: SMEM (1,) f32; x_ref: (2, TR, TL) pre-paired pool members; o_ref: (TR, TL)."""
    a = jnp.maximum(x_ref[0].astype(jnp.float32), jnp.float32(eps))
    b = jnp.maximum(x_ref[1].astype(jnp.float32), jnp.float32(eps))
    o_ref[...] = _gem_pair(a, b, p_ref[0], o_ref.dtype)


def _gem_kernel_packed_bf16(p_ref, w_ref, o_ref, *, eps):
    """p_ref: SMEM (1,) f32; w_ref: (TR, TL) uint32, each word = one adjacent bf16 pair."""
    w = w_ref[...]
    # bf16 -> f32 promotion is exactly "append 16 zero bits"; the pool is symmetric in (a, b),
    # so the low/high ordering inside the word is irrelevant.
    a = pltpu.bitcast(w << 16, jnp.float32)
    b = pltpu.bitcast(w & jnp.uint32(0xFFFF0000), jnp.float32)
    a = jnp.maximum(a, jnp.float32(eps))
    b = jnp.maximum(b, jnp.float32(eps))
    o_ref[...] = _gem_pair(a, b, p_ref[0], o_ref.dtype)


# --------------------------------------------------------------------------------------
# Tile planning
# --------------------------------------------------------------------------------------
def _tile_candidates(dim, unit):
    """Unit-multiple divisors of `dim`, descending; falls back to [dim] (a full-dim block is
    always legal) when no unit-multiple divisor exists."""
    cands = [t for t in range(unit, dim + 1, unit) if dim % t == 0]
    return sorted(cands, reverse=True) or [dim]


def _plan_tiles(rows, lh, row_unit, in_bytes, out_bytes, row_target, lane_target):
    """Pick (TR, TL): unit-aligned divisors near the targets, shrunk to (a) keep the
    double-buffered working set under the VMEM budget and (b) give large problems enough grid
    steps for megacore sharding / pipelining.  Rows are shrunk before lanes so output stores
    stay lane-dense (the biggest single store-path lever)."""
    row_c = _tile_candidates(rows, row_unit)
    lane_c = _tile_candidates(lh, 128)

    def pick(cands, target):
        for t in cands:
            if t <= target:
                return t
        return cands[-1]

    def smaller(cands, cur):
        nxt = [t for t in cands if t < cur]
        return nxt[0] if nxt else None

    tr, tl = pick(row_c, row_target), pick(lane_c, lane_target)

    def step_bytes(a, b):
        return a * b * (in_bytes + out_bytes)

    # (a) VMEM budget (double-buffered in + out).
    # TODO(synk): pathologically indivisible shapes (huge prime-ish rows/Lh) fall back to a
    # full-dim block that can still exceed the budget; they would need padded / masked
    # remainder blocks.
    while 2 * step_bytes(tr, tl) > _VMEM_DATA_BUDGET:
        ntr, ntl = smaller(row_c, tr), smaller(lane_c, tl)
        if ntr is not None:
            tr = ntr
        elif ntl is not None:
            tl = ntl
        else:
            break

    # (b) Megacore / pipelining: large problems need >=2 (ideally >=4) grid steps, otherwise one
    # TensorCore idles and there is nothing to double-buffer.
    total = rows * lh * (in_bytes + out_bytes)
    min_steps = 4 if total >= (32 << 20) else (2 if total >= (8 << 20) else 1)
    while (rows // tr) * (lh // tl) < min_steps:
        ntr, ntl = smaller(row_c, tr), smaller(lane_c, tl)
        if ntr is not None:
            tr = ntr
        elif ntl is not None:
            tl = ntl
        else:
            break

    return tr, tl


# --------------------------------------------------------------------------------------
# Wrapper
# --------------------------------------------------------------------------------------
def _pack_bf16_pairs(x2):
    """Pack adjacent bf16 pairs (rows, Lh, 2) into one uint32 per output element.

    The width-changing bitcast is a pure re-view of the bytes (best case: no data movement).
    The shift/or fallback costs one elementwise pass, still no wider than the f32 pre-pair pass.
    """
    try:
        return jax.lax.bitcast_convert_type(x2, jnp.uint32)
    except Exception:  # pragma: no cover - backends without width-changing bitcast
        u16 = jax.lax.bitcast_convert_type(x2, jnp.uint16).astype(jnp.uint32)
        return u16[..., 0] | (u16[..., 1] << 16)


def gem_pallas(x, p, eps=1e-6, *, row_tile=512, lane_tile=2048, input_buffers=None):
    """GeM pooling: avg_pool1d(clamp(x, min=eps) ** p, 2) ** (1/p) for x of shape (N, C, L).

    `input_buffers` is an optional sweep knob (e.g. 3) mapped to pipeline_mode=pl.Buffered(k)
    on the x input spec if a profile shows exposed DMA; default leaves the standard 2-deep
    pipeline untouched.
    """
    N, C, L = x.shape
    Lh = L // 2                       # PyTorch avg_pool1d floors odd lengths
    if Lh == 0:
        raise ValueError("GeM with kernel_size=2 needs L >= 2")
    if L % 2:
        x = x[..., : 2 * Lh]          # drop trailing element, like avg_pool1d

    rows = N * C
    out_dtype = x.dtype
    itemsize = jnp.dtype(out_dtype).itemsize
    row_unit = {1: 32, 2: 16}.get(itemsize, 8)   # dtype-aware sublane unit (native packed tile)

    p_arr = jnp.asarray(p, jnp.float32).reshape(1)

    if out_dtype == jnp.bfloat16:
        # Zero-copy(ish) path: one uint32 lane per output element, unpacked in-kernel.
        xin = _pack_bf16_pairs(x.reshape(rows, Lh, 2))
        in_bytes = 4
        kernel = functools.partial(_gem_kernel_packed_bf16, eps=float(eps))

        def make_in_spec(tr, tl, extra):
            return pl.BlockSpec((tr, tl), lambda i, j: (i, j), **extra)
    else:
        # f32 / generic path: pre-pair adjacent elements with the pair axis LEADING so both the
        # (2, TR, TL) input block and the (TR, TL) output block are sublane/lane dense.
        # (See module TODO(synk): this is the one remaining extra HBM pass.)
        xin = x.reshape(rows, Lh, 2).transpose(2, 0, 1)
        in_bytes = 2 * itemsize
        kernel = functools.partial(_gem_kernel_paired, eps=float(eps))

        def make_in_spec(tr, tl, extra):
            return pl.BlockSpec((2, tr, tl), lambda i, j: (0, i, j), **extra)

    tr, tl = _plan_tiles(rows, Lh, row_unit, in_bytes, itemsize, row_tile, lane_tile)
    grid = (rows // tr, Lh // tl)
    step_bytes = tr * tl * (in_bytes + itemsize)

    extra = {}
    if input_buffers is not None:
        extra["pipeline_mode"] = pl.Buffered(int(input_buffers))

    out = pl.pallas_call(
        kernel,
        out_shape=jax.ShapeDtypeStruct((rows, Lh), out_dtype),
        grid=grid,
        in_specs=[
            pl.BlockSpec(memory_space=pltpu.MemorySpace.SMEM),   # learnable scalar p
            make_in_spec(tr, tl, extra),
        ],
        out_specs=pl.BlockSpec((tr, tl), lambda i, j: (i, j)),
        compiler_params=pltpu.CompilerParams(
            dimension_semantics=("parallel", "parallel"),
            # v5e's scoped-VMEM default is only 16 MiB; size the limit to the real
            # double-buffered working set + margin, staying under v7x's 64 MiB physical VMEM.
            vmem_limit_bytes=int(min(2 * step_bytes + (16 << 20), 60 << 20)),
        ),
    )(p_arr, xin)

    return out.reshape(N, C, Lh)


# --------------------------------------------------------------------------------------
# Pure-JAX reference and self-test
# --------------------------------------------------------------------------------------
def gem_reference(x, p, eps=1e-6):
    """Pure-JAX reference of the PyTorch forward."""
    pv = jnp.asarray(p, jnp.float32).reshape(-1)[0]
    L = x.shape[-1]
    xc = jnp.maximum(x.astype(jnp.float32), eps) ** pv
    xc = xc[..., : 2 * (L // 2)]
    pooled = 0.5 * (xc[..., 0::2] + xc[..., 1::2])
    return pooled ** (1.0 / pv)


if __name__ == "__main__":
    eps = 1e-6
    # Deterministic parameter init matching nn.Parameter(torch.ones(1) * 3).
    p = jnp.ones((1,), dtype=jnp.float32) * 3.0
    k1, k2, k3 = jax.random.split(jax.random.PRNGKey(0), 3)

    # 1) Small f32 shape consistent with the module's (N, C, L) usage.
    x_small = jax.random.uniform(k1, (2, 4, 16), dtype=jnp.float32)
    out_small = jax.block_until_ready(gem_pallas(x_small, p, eps=eps))
    ref_small = gem_reference(x_small, p, eps=eps)
    assert out_small.shape == (2, 4, 8), out_small.shape
    assert jnp.allclose(out_small, ref_small, atol=1e-6, rtol=1e-4), "small f32 mismatch"

    # 2) Larger f32 shape exercising the pipelined multi-block grid (2 parallel row blocks).
    x_big = jax.random.uniform(k2, (4, 256, 4096), dtype=jnp.float32)
    out_big = jax.block_until_ready(gem_pallas(x_big, p, eps=eps))
    ref_big = gem_reference(x_big, p, eps=eps)
    assert out_big.shape == (4, 256, 2048), out_big.shape
    assert jnp.allclose(out_big, ref_big, atol=1e-6, rtol=1e-4), "tiled f32 mismatch"

    # 3) bf16 path: adjacent pairs packed into uint32 (no wrapper deinterleave pass).
    x_bf16 = jax.random.uniform(k3, (2, 8, 256), dtype=jnp.float32).astype(jnp.bfloat16)
    out_bf16 = jax.block_until_ready(gem_pallas(x_bf16, p, eps=eps))
    ref_bf16 = gem_reference(x_bf16.astype(jnp.float32), p, eps=eps)
    assert out_bf16.shape == (2, 8, 128), out_bf16.shape
    assert out_bf16.dtype == jnp.bfloat16
    assert jnp.allclose(out_bf16.astype(jnp.float32), ref_bf16, atol=2e-2, rtol=2e-2), \
        "bf16 mismatch"

    print("KERNEL_OK")
</pallas_src>

<mosaic_0001>
module attributes {stable_mosaic.version = 11 : i64} {
  func.func @_gem_kernel_paired(%arg0: i32, %arg1: i32, %arg2: memref<1xf32, #tpu.memory_space<smem>>, %arg3: memref<2x8x8xf32, #tpu.memory_space<vmem>>, %arg4: memref<8x8xf32, #tpu.memory_space<vmem>>) attributes {dimension_semantics = [#tpu.dimension_semantics<parallel>, #tpu.dimension_semantics<parallel>], iteration_bounds = array<i64: 1, 1>, scalar_prefetch = 0 : i64, scratch_operands = 0 : i64, tpu.core_type = #tpu.core_type<tc>, window_params = [{transform_indices = @transform_0, window_bounds = array<i64: 1>}, {transform_indices = @transform_1, window_bounds = array<i64: 2, 8, 8>}, {transform_indices = @transform_2, window_bounds = array<i64: 8, 8>}]} {
    %c0 = arith.constant 0 : index
    %c0_0 = arith.constant 0 : index
    %c0_1 = arith.constant 0 : index
    %0 = vector.load %arg3[%c0, %c0_0, %c0_1] : memref<2x8x8xf32, #tpu.memory_space<vmem>>, vector<1x8x8xf32>
    %1 = vector.shape_cast %0 : vector<1x8x8xf32> to vector<8x8xf32>
    %cst = arith.constant 9.99999997E-7 : f32
    %2 = vector.broadcast %cst : f32 to vector<8x8xf32>
    %3 = arith.maximumf %1, %2 : vector<8x8xf32>
    %c1 = arith.constant 1 : index
    %c0_2 = arith.constant 0 : index
    %c0_3 = arith.constant 0 : index
    %4 = vector.load %arg3[%c1, %c0_2, %c0_3] : memref<2x8x8xf32, #tpu.memory_space<vmem>>, vector<1x8x8xf32>
    %5 = vector.shape_cast %4 : vector<1x8x8xf32> to vector<8x8xf32>
    %cst_4 = arith.constant 9.99999997E-7 : f32
    %6 = vector.broadcast %cst_4 : f32 to vector<8x8xf32>
    %7 = arith.maximumf %5, %6 : vector<8x8xf32>
    %c0_5 = arith.constant 0 : index
    %8 = memref.load %arg2[%c0_5] : memref<1xf32, #tpu.memory_space<smem>>
    %cst_6 = arith.constant 1.000000e+00 : f32
    %9 = arith.divf %cst_6, %8 : f32
    %10 = math.log %3 : vector<8x8xf32>
    %11 = vector.broadcast %8 : f32 to vector<8x8xf32>
    %12 = arith.mulf %11, %10 : vector<8x8xf32>
    %13 = math.log %7 : vector<8x8xf32>
    %14 = vector.broadcast %8 : f32 to vector<8x8xf32>
    %15 = arith.mulf %14, %13 : vector<8x8xf32>
    %16 = arith.maximumf %12, %15 : vector<8x8xf32>
    %17 = arith.minimumf %12, %15 : vector<8x8xf32>
    %18 = arith.subf %17, %16 : vector<8x8xf32>
    %19 = math.exp %18 : vector<8x8xf32>
    %cst_7 = arith.constant 1.000000e+00 : f32
    %20 = vector.broadcast %cst_7 : f32 to vector<8x8xf32>
    %21 = arith.addf %20, %19 : vector<8x8xf32>
    %22 = math.log %21 : vector<8x8xf32>
    %23 = arith.addf %16, %22 : vector<8x8xf32>
    %cst_8 = arith.constant 0.693147182 : f32
    %24 = vector.broadcast %cst_8 : f32 to vector<8x8xf32>
    %25 = arith.subf %23, %24 : vector<8x8xf32>
    %26 = vector.broadcast %9 : f32 to vector<8x8xf32>
    %27 = arith.mulf %25, %26 : vector<8x8xf32>
    %28 = math.exp %27 : vector<8x8xf32>
    %c0_9 = arith.constant 0 : index
    %c0_10 = arith.constant 0 : index
    %29 = vector.load %arg4[%c0_9, %c0_10] : memref<8x8xf32, #tpu.memory_space<vmem>>, vector<8x8xf32>
    tpu.vector_store %arg4[%c0_9, %c0_10], %28 {strides = array<i32>} : memref<8x8xf32, #tpu.memory_space<vmem>>, vector<8x8xf32>,
    return
  }
  func.func @transform_0(%arg0: i32, %arg1: i32) -> i32 {
    %c0_i32 = arith.constant 0 : i32
    %c0_i32_0 = arith.constant 0 : i32
    return %c0_i32 : i32
  }
  func.func @transform_1(%arg0: i32, %arg1: i32) -> (i32, i32, i32) {
    %c0_i32 = arith.constant 0 : i32
    %c0_i32_0 = arith.constant 0 : i32
    return %c0_i32, %arg0, %arg1 : i32, i32, i32
  }
  func.func @transform_2(%arg0: i32, %arg1: i32) -> (i32, i32) {
    %c0_i32 = arith.constant 0 : i32
    return %arg0, %arg1 : i32, i32
  }
}

</mosaic_0001>

<bundles_post_ra>
// kernel: tpu_custom_call.1
= control target key start
LH: loop header
LB: loop body
LE: loop exit
PB: predicated region body
PF: predicated region fallthrough
CT: control target
= control target key end

     0   :  { %8 = vsyncpa [#allocation4], 0  ;;  %s187_s0 = inlined_call_operand.<no memory space> [shape: f32[1], index: 0, kind: input, shape index: {}]   ;;  %s188_s1 = inlined_call_operand.hbm [shape: f32[2,8,8], index: 1, kind: input, shape index: {}]   ;;  %s189_s2 = inlined_call_operand.hbm [shape: f32[8,8], index: 2, kind: output, shape index: {}]  }
   0x1   :  { %9 = vsyncpa [#allocation5], 0  ;;  %s141_s9 = smov [#allocation3]   ;;  %s93_s13 = scalar_lea.hbm %s188_s1, 256 }
   0x2   :  { %s17_s10 = sshll.u32 %s141_s9, 4  ;;  %p94_p0 = scmp.ne.s32.totalorder %s188_s1, %s93_s13  ;;  %s18_s10 = int_to_ptr.vmem [resolvable:$true] %s17_s10 }
   0x3   :  { %p97_p1 = scmp.lt.u32.totalorder %s93_s13, %s188_s1 }
   0x5   :  { %p99_p2 = pnand %p97_p1, %p94_p0 }
   0x7   :  { %102 = shalt.err (!%p99_p2)
}
   0x8   :  { %s103_s18 = scalar_lea.vmem %s18_s10, 256  ;;  %p108_p4 = scmp.lt.s32.totalorder %s18_s10, %s18_s10 }
   0x9   :  { %p104_p3 = scmp.ne.s32.totalorder %s18_s10, %s103_s18  ;;  %p109_p5 = scmp.lt.s32.totalorder %s103_s18, %s103_s18 }
   0xb   :  { %p110_p6 = por %p109_p5, %p108_p4 }
   0xd   :  { %p111_p7 = pnand %p110_p6, %p104_p3 }
   0xf   :  { %114 = shalt.err (!%p111_p7)
}
  0x10   :  { %s142_s19 = smov 128   ;;  %s143_s20 = smov 8  }
  0x11   :  { %23 = dma.hbm_to_vmem [thread:$0]  %s188_s1, 256, %s18_s10, [#allocation4], %s142_s19, %s142_s19, %s143_s20  }
  0x12   :  { %137 = dma.done.wait [#allocation4], 256  }
  0x13   :  { %138 = vsyncadd [#allocation4], 4294967040  ;;  %v33_v0 = vstv %s187_s0  ;;  %v27_v1 = vld [vmem:[#allocation3] sm:$0xff]  ;;  %v30_v2 = vld [vmem:[#allocation3 + $0x8] sm:$0xff]  ;;  %s144_s1 = smov [#allocation6]   ;;  %vm57_vm0 = vcmask 64512  }
  0x14   :  { %81 = vrcp.f32 %v33_v0  ;;  %v28_v3 = vmax.f32 %v27_v1, 1e-06  ;;  %v31_v4 = vmax.f32 %v30_v2, 1e-06  ;;  %s65_s25 = sshll.u32 %s144_s1, 4  ;;  %s66_s25 = int_to_ptr.vmem [resolvable:$true] %s65_s25 }
  0x15   :  { %s115_s26 = scalar_lea.vmem %s66_s25, 128  ;;  %p120_p9 = scmp.lt.s32.totalorder %s66_s25, %s66_s25 }
  0x16   :  { %83 = vlog2.f32 %v28_v3  ;;  %p116_p8 = scmp.ne.s32.totalorder %s66_s25, %s115_s26  ;;  %p121_p10 = scmp.lt.s32.totalorder %s115_s26, %s115_s26 }
  0x17   :  { %85 = vlog2.f32 %v31_v4 }
  0x18   :  { %p122_p11 = por %p121_p10, %p120_p9 }
  0x1a   :  { %p123_p12 = pnand %p122_p11, %p116_p8 }
  0x1e   :  { %v82_v5 = vpop.eup %81 }
  0x1f   :  { %75 = vpush %v82_v5 }
  0x20   :  { %v84_v6 = vpop.eup %83 }
  0x21   :  { %v86_v7 = vpop.eup %85  ;;  %v37_v8 = vmul.f32 0.6931472, %v84_v6 }
  0x22   :  { %v41_v9 = vmul.f32 0.6931472, %v86_v7 }
  0x23   :  { %v39_v10 = vmul.f32 %v37_v8, %v33_v0 }
  0x24   :  { %v42_v11 = vmul.f32 %v41_v9, %v33_v0 }
  0x26   :  { %v44_v12 = vmin.f32 %v39_v10, %v42_v11  ;;  %v43_v13 = vmax.f32 %v39_v10, %v42_v11 }
  0x28   :  { %v45_v14 = vsub.f32 %v44_v12, %v43_v13 }
  0x2a   :  { %v46_v15 = vmul.f32 1.442695, %v45_v14 }
  0x2c   :  { %87 = vpow2.f32 %v46_v15 }
  0x36   :  { %v88_v16 = vpop.eup %87 }
  0x37   :  { %v48_v17 = vadd.f32 1.0, %v88_v16 }
  0x39   :  { %89 = vlog2.f32 %v48_v17 }
  0x43   :  { %v90_v18 = vpop.eup %89 }
  0x44   :  { %v50_v19 = vmul.f32 0.6931472, %v90_v18 }
  0x46   :  { %v51_v20 = vadd.f32 %v50_v19, %v43_v13 }
  0x48   :  { %v74_v21 = vadd.f32 -0.6931472, %v51_v20 }
  0x50   :  { %s76_s0 = spop %75 }
  0x51   :  { %v53_v22 = vstv %s76_s0 }
  0x52   :  { %v54_v23 = vmul.f32 %v74_v21, %v53_v22 }
  0x54   :  { %v55_v24 = vmul.f32 1.442695, %v54_v23 }
  0x56   :  { %91 = vpow2.f32 %v55_v24 }
  0x60   :  { %v92_v25 = vpop.eup %91 }
  0x61   :  { %58 = vst.msk [vmem:[#allocation6] sm:$0xff] %vm57_vm0, %v92_v25 }
  0x62   :  { %126 = shalt.err (!%p123_p12)
}
  0x63   :  { %s127_s29 = scalar_lea.hbm %s189_s2, 128 }
  0x64   :  { %p128_p13 = scmp.ne.s32.totalorder %s189_s2, %s127_s29  ;;  %p131_p0 = scmp.lt.u32.totalorder %s127_s29, %s189_s2 }
  0x66   :  { %p133_p1 = pnand %p131_p0, %p128_p13 }
  0x68   :  { %136 = shalt.err (!%p133_p1)
}
  0x69   :  { %68 = dma.vmem_to_hbm [thread:$0]  %s66_s25, 128, %s189_s2, [#allocation5]  }
  0x6a   :  { %139 = dma.done.wait [#allocation5], 128  }
  0x6b   :  { %140 = vsyncadd [#allocation5], 4294967168 }
  0x6c   :  { %72 = vsyncpa [#allocation4], 1 }
  0x6d   :  { %73 = vsyncpa [#allocation5], 1 }

</bundles_post_ra>
